<compile_context>
chip_gen: v6e
topology: v6e:2x2x1
jax: 0.10.0
libtpu: 0.0.40
codegen_flags: <defaults>
</compile_context>

<pallas_src>
import functools

import jax
import jax.numpy as jnp
from jax.experimental import pallas as pl
from jax.experimental.pallas import tpu as pltpu


def _round_up(x, m):
    return (x + m - 1) // m * m


def _vmem_budget():
    """Per-generation (per-block byte budget, scoped-VMEM limit)."""
    block_bytes, vmem_limit = 2 << 20, 32 << 20            # safe default (v7x: 64 MiB/TC)
    try:
        info = pltpu.get_tpu_info()
        if int(getattr(info, "vmem_capacity_bytes", 0)) >= (96 << 20):
            block_bytes, vmem_limit = 4 << 20, 64 << 20    # v5e / v6e: 128 MiB VMEM
    except Exception:
        pass
    return block_bytes, vmem_limit


def _semantic_ce_kernel(*refs, smoothing, norm_factors):
    """One batch-tile grid point; the (static, tiny) level loop is unrolled.

    refs = (logits_0, ..., logits_{L-1}, labels, out)
      logits_l: (TB, C_l) block in its native dtype, NO class padding
      labels:   (TB, L) int32 block (column l = labels for level l)
      out:      (1, 8, 128) f32 block -- per-tile weighted partial loss sum
    """
    num_levels = len(norm_factors)
    logit_refs = refs[:num_levels]
    labels_ref = refs[num_levels]
    out_ref = refs[num_levels + 1]

    labels_tile = labels_ref[...]                            # (TB, L) int32
    s = float(smoothing)

    total = jnp.float32(0.0)
    for lvl in range(num_levels):
        x = logit_refs[lvl][...].astype(jnp.float32)         # (TB, C_l) f32 in-kernel
        tb, c = x.shape
        lab = labels_tile[:, lvl:lvl + 1]                    # (TB, 1) int32

        # Numerically stable log-softmax pieces over exactly the real classes.
        m = jnp.max(x, axis=-1, keepdims=True)               # (TB, 1)
        shifted = x - m
        lse = jnp.log(jnp.sum(jnp.exp(shifted), axis=-1, keepdims=True))

        # Gather shifted logit at the (clamped) label via iota-compare.
        col = jax.lax.broadcasted_iota(jnp.int32, (tb, c), 1)
        lab_c = jnp.maximum(lab, 0)
        shifted_at_lab = jnp.sum(jnp.where(col == lab_c, shifted, 0.0),
                                 axis=-1, keepdims=True)     # (TB, 1)

        # ce = -(1-s)*log_pred[label] - (s/C)*sum_c log_pred[c]
        #    = lse - (1-s)*shifted[label] - (s/C)*sum_c shifted[c]
        if s == 0.0:                                         # trace-time specialization
            ce = lse - shifted_at_lab
        else:
            sum_shifted = jnp.sum(shifted, axis=-1, keepdims=True)
            ce = lse - (1.0 - s) * shifted_at_lab - (s / float(c)) * sum_shifted

        # Rows with negative labels (and batch-padding rows, padded to -1) -> 0.
        valid = (lab >= 0).astype(jnp.float32)
        total = total + jnp.float32(norm_factors[lvl]) * jnp.sum(ce * valid)

    # Lane-dense (1, 8, 128) store of the per-tile scalar; wrapper reads [:,0,0].
    out_ref[...] = jnp.full(out_ref.shape, total, dtype=jnp.float32)


def semantic_softmax_loss(semantic_outputs, semantic_labels,
                          normalization_factor_list, smoothing):
    """semantic_outputs: list of (B, C_i) arrays; semantic_labels: (B, L) int."""
    num_levels = len(semantic_outputs)
    batch = int(semantic_outputs[0].shape[0])
    class_counts = [int(o.shape[-1]) for o in semantic_outputs]
    itemsize = max(jnp.dtype(o.dtype).itemsize for o in semantic_outputs)

    # Batch tile from the TOTAL per-row footprint (all levels stream each step):
    # double-buffered native-dtype inputs + f32 temporaries of the widest level.
    block_budget, vmem_limit = _vmem_budget()
    per_row_bytes = 2 * sum(class_counts) * itemsize + 4 * 4 * max(class_counts)
    tb = (block_budget // max(per_row_bytes, 1)) // 8 * 8
    tb = max(8, min(tb, 1024, _round_up(batch, 8)))
    bp = _round_up(batch, tb)
    num_tiles = bp // tb

    # Batch padding only (class dims stay native -> no wasted HBM traffic).
    if bp != batch:
        logits = [jnp.pad(o, ((0, bp - batch), (0, 0))) for o in semantic_outputs]
        labels = jnp.pad(semantic_labels.astype(jnp.int32),
                         ((0, bp - batch), (0, 0)), constant_values=-1)
    else:
        logits = list(semantic_outputs)
        labels = semantic_labels.astype(jnp.int32)

    kernel = functools.partial(
        _semantic_ce_kernel,
        smoothing=float(smoothing),
        norm_factors=tuple(float(n) for n in normalization_factor_list))

    in_specs = [pl.BlockSpec((tb, c), lambda b: (b, 0)) for c in class_counts]
    in_specs.append(pl.BlockSpec((tb, num_levels), lambda b: (b, 0)))   # labels

    partials = pl.pallas_call(
        kernel,
        out_shape=jax.ShapeDtypeStruct((num_tiles, 8, 128), jnp.float32),
        grid=(num_tiles,),
        in_specs=in_specs,
        out_specs=pl.BlockSpec((1, 8, 128), lambda b: (b, 0, 0)),
        compiler_params=pltpu.CompilerParams(
            dimension_semantics=("parallel",),     # megacore-shardable on v7x
            vmem_limit_bytes=vmem_limit,
        ),
    )(*logits, labels)

    # Tiny final reduction over tiles + static 1/B scale in plain JAX.
    # (Matches the reference: mean over the FULL batch incl. invalid-label rows.)
    return jnp.sum(partials[:, 0, 0]) * jnp.float32(1.0 / batch)


def _reference(semantic_outputs, semantic_labels, normalization_factor_list, smoothing):
    """Pure-JAX reference mirroring the PyTorch module, for sanity-checking."""
    total = 0.0
    for i, outputs_i in enumerate(semantic_outputs):
        labels_i = semantic_labels[:, i]
        log_preds = jax.nn.log_softmax(outputs_i.astype(jnp.float32), axis=1)
        labels_valid = jnp.where(labels_i < 0, 0, labels_i)
        num_classes = outputs_i.shape[-1]
        oh = jax.nn.one_hot(labels_valid, num_classes, dtype=jnp.float32)
        oh = oh * (1 - smoothing) + smoothing / num_classes
        ce = -(oh * log_preds)
        ce = ce * (labels_i >= 0)[:, None]
        loss_i = ce.sum(axis=-1).mean()
        total = total + loss_i * normalization_factor_list[i]
    return total


if __name__ == "__main__":
    key = jax.random.PRNGKey(0)
    B = 8
    class_counts = [8, 16, 32]                 # three semantic hierarchy levels
    normalization_factor_list = [1.0, 0.5, 0.25]

    keys = jax.random.split(key, 2 * len(class_counts))
    semantic_outputs = []
    labels_cols = []
    for lvl, C in enumerate(class_counts):
        logits = jax.random.normal(keys[2 * lvl], (B, C), dtype=jnp.float32)
        labels = jax.random.randint(keys[2 * lvl + 1], (B,), 0, C, dtype=jnp.int32)
        labels = labels.at[1].set(-1)          # exercise the invalid-label mask
        semantic_outputs.append(logits)
        labels_cols.append(labels)
    semantic_labels = jnp.stack(labels_cols, axis=1)           # (B, num_levels)

    for smoothing in (0.1, 0.0):               # exercise both trace-time branches
        loss = semantic_softmax_loss(semantic_outputs, semantic_labels,
                                     normalization_factor_list, smoothing)
        loss = jax.block_until_ready(loss)
        ref = _reference(semantic_outputs, semantic_labels,
                         normalization_factor_list, smoothing)
        assert jnp.allclose(loss, ref, rtol=1e-4, atol=1e-5), (smoothing, loss, ref)

    print("KERNEL_OK")
</pallas_src>

<mosaic_0001>
module attributes {stable_mosaic.version = 11 : i64} {
  func.func @_semantic_ce_kernel(%arg0: i32, %arg1: memref<8x8xf32, #tpu.memory_space<vmem>>, %arg2: memref<8x16xf32, #tpu.memory_space<vmem>>, %arg3: memref<8x32xf32, #tpu.memory_space<vmem>>, %arg4: memref<8x3xi32, #tpu.memory_space<vmem>>, %arg5: memref<1x8x128xf32, #tpu.memory_space<vmem>>) attributes {dimension_semantics = [#tpu.dimension_semantics<parallel>], iteration_bounds = array<i64: 1>, scalar_prefetch = 0 : i64, scratch_operands = 0 : i64, tpu.core_type = #tpu.core_type<tc>, window_params = [{transform_indices = @transform_0, window_bounds = array<i64: 8, 8>}, {transform_indices = @transform_1, window_bounds = array<i64: 8, 16>}, {transform_indices = @transform_2, window_bounds = array<i64: 8, 32>}, {transform_indices = @transform_3, window_bounds = array<i64: 8, 3>}, {transform_indices = @transform_4, window_bounds = array<i64: 1, 8, 128>}]} {
    %c0 = arith.constant 0 : index
    %c0_0 = arith.constant 0 : index
    %0 = vector.load %arg4[%c0, %c0_0] : memref<8x3xi32, #tpu.memory_space<vmem>>, vector<8x3xi32>
    %c0_1 = arith.constant 0 : index
    %c0_2 = arith.constant 0 : index
    %1 = vector.load %arg1[%c0_1, %c0_2] : memref<8x8xf32, #tpu.memory_space<vmem>>, vector<8x8xf32>
    %2 = vector.extract_strided_slice %0 {offsets = [0, 0], sizes = [8, 1], strides = [1, 1]} : vector<8x3xi32> to vector<8x1xi32>
    %cst = arith.constant dense<0xFF800000> : vector<8xf32>
    %3 = vector.multi_reduction <maximumf>, %1, %cst [1] : vector<8x8xf32> to vector<8xf32>
    %4 = vector.shape_cast %3 : vector<8xf32> to vector<8x1xf32>
    %5 = vector.broadcast %4 : vector<8x1xf32> to vector<8x8xf32>
    %6 = arith.subf %1, %5 : vector<8x8xf32>
    %7 = math.exp %6 : vector<8x8xf32>
    %cst_3 = arith.constant dense<0.000000e+00> : vector<8xf32>
    %8 = vector.multi_reduction <add>, %7, %cst_3 [1] : vector<8x8xf32> to vector<8xf32>
    %9 = vector.shape_cast %8 : vector<8xf32> to vector<8x1xf32>
    %10 = math.log %9 : vector<8x1xf32>
    %11 = tpu.iota {dimensions = array<i32: 1>} : vector<8x8xi32>
    %c0_i32 = arith.constant 0 : i32
    %12 = vector.broadcast %c0_i32 : i32 to vector<8x1xi32>
    %13 = arith.maxsi %2, %12 : vector<8x1xi32>
    %14 = vector.broadcast %13 : vector<8x1xi32> to vector<8x8xi32>
    %15 = arith.cmpi eq, %11, %14 : vector<8x8xi32>
    %cst_4 = arith.constant 0.000000e+00 : f32
    %16 = vector.broadcast %cst_4 : f32 to vector<8x8xf32>
    %17 = arith.select %15, %6, %16 : vector<8x8xi1>, vector<8x8xf32>
    %cst_5 = arith.constant dense<0.000000e+00> : vector<8xf32>
    %18 = vector.multi_reduction <add>, %17, %cst_5 [1] : vector<8x8xf32> to vector<8xf32>
    %19 = vector.shape_cast %18 : vector<8xf32> to vector<8x1xf32>
    %cst_6 = arith.constant dense<0.000000e+00> : vector<8xf32>
    %20 = vector.multi_reduction <add>, %6, %cst_6 [1] : vector<8x8xf32> to vector<8xf32>
    %21 = vector.shape_cast %20 : vector<8xf32> to vector<8x1xf32>
    %cst_7 = arith.constant 0.899999976 : f32
    %22 = vector.broadcast %cst_7 : f32 to vector<8x1xf32>
    %23 = arith.mulf %22, %19 : vector<8x1xf32>
    %24 = arith.subf %10, %23 : vector<8x1xf32>
    %cst_8 = arith.constant 1.250000e-02 : f32
    %25 = vector.broadcast %cst_8 : f32 to vector<8x1xf32>
    %26 = arith.mulf %25, %21 : vector<8x1xf32>
    %27 = arith.subf %24, %26 : vector<8x1xf32>
    %c0_i32_9 = arith.constant 0 : i32
    %28 = vector.broadcast %c0_i32_9 : i32 to vector<8x1xi32>
    %29 = arith.cmpi sge, %2, %28 : vector<8x1xi32>
    %30 = arith.extui %29 : vector<8x1xi1> to vector<8x1xi32>
    %31 = arith.sitofp %30 : vector<8x1xi32> to vector<8x1xf32>
    %32 = arith.mulf %27, %31 : vector<8x1xf32>
    %33 = vector.shape_cast %32 : vector<8x1xf32> to vector<1x8x1xf32>
    %cst_10 = arith.constant dense<0.000000e+00> : vector<1xf32>
    %34 = vector.multi_reduction <add>, %33, %cst_10 [1, 2] : vector<1x8x1xf32> to vector<1xf32>
    %35 = vector.shape_cast %34 : vector<1xf32> to vector<1x1x1xf32>
    %36 = vector.extract %35[0, 0, 0] : f32 from vector<1x1x1xf32>
    %cst_11 = arith.constant 1.000000e+00 : f32
    %37 = arith.mulf %cst_11, %36 : f32
    %cst_12 = arith.constant 0.000000e+00 : f32
    %38 = arith.addf %cst_12, %37 : f32
    %c0_13 = arith.constant 0 : index
    %c0_14 = arith.constant 0 : index
    %39 = vector.load %arg2[%c0_13, %c0_14] : memref<8x16xf32, #tpu.memory_space<vmem>>, vector<8x16xf32>
    %40 = vector.extract_strided_slice %0 {offsets = [0, 1], sizes = [8, 1], strides = [1, 1]} : vector<8x3xi32> to vector<8x1xi32>
    %cst_15 = arith.constant dense<0xFF800000> : vector<8xf32>
    %41 = vector.multi_reduction <maximumf>, %39, %cst_15 [1] : vector<8x16xf32> to vector<8xf32>
    %42 = vector.shape_cast %41 : vector<8xf32> to vector<8x1xf32>
    %43 = vector.broadcast %42 : vector<8x1xf32> to vector<8x16xf32>
    %44 = arith.subf %39, %43 : vector<8x16xf32>
    %45 = math.exp %44 : vector<8x16xf32>
    %cst_16 = arith.constant dense<0.000000e+00> : vector<8xf32>
    %46 = vector.multi_reduction <add>, %45, %cst_16 [1] : vector<8x16xf32> to vector<8xf32>
    %47 = vector.shape_cast %46 : vector<8xf32> to vector<8x1xf32>
    %48 = math.log %47 : vector<8x1xf32>
    %49 = tpu.iota {dimensions = array<i32: 1>} : vector<8x16xi32>
    %c0_i32_17 = arith.constant 0 : i32
    %50 = vector.broadcast %c0_i32_17 : i32 to vector<8x1xi32>
    %51 = arith.maxsi %40, %50 : vector<8x1xi32>
    %52 = vector.broadcast %51 : vector<8x1xi32> to vector<8x16xi32>
    %53 = arith.cmpi eq, %49, %52 : vector<8x16xi32>
    %cst_18 = arith.constant 0.000000e+00 : f32
    %54 = vector.broadcast %cst_18 : f32 to vector<8x16xf32>
    %55 = arith.select %53, %44, %54 : vector<8x16xi1>, vector<8x16xf32>
    %cst_19 = arith.constant dense<0.000000e+00> : vector<8xf32>
    %56 = vector.multi_reduction <add>, %55, %cst_19 [1] : vector<8x16xf32> to vector<8xf32>
    %57 = vector.shape_cast %56 : vector<8xf32> to vector<8x1xf32>
    %cst_20 = arith.constant dense<0.000000e+00> : vector<8xf32>
    %58 = vector.multi_reduction <add>, %44, %cst_20 [1] : vector<8x16xf32> to vector<8xf32>
    %59 = vector.shape_cast %58 : vector<8xf32> to vector<8x1xf32>
    %cst_21 = arith.constant 0.899999976 : f32
    %60 = vector.broadcast %cst_21 : f32 to vector<8x1xf32>
    %61 = arith.mulf %60, %57 : vector<8x1xf32>
    %62 = arith.subf %48, %61 : vector<8x1xf32>
    %cst_22 = arith.constant 6.250000e-03 : f32
    %63 = vector.broadcast %cst_22 : f32 to vector<8x1xf32>
    %64 = arith.mulf %63, %59 : vector<8x1xf32>
    %65 = arith.subf %62, %64 : vector<8x1xf32>
    %c0_i32_23 = arith.constant 0 : i32
    %66 = vector.broadcast %c0_i32_23 : i32 to vector<8x1xi32>
    %67 = arith.cmpi sge, %40, %66 : vector<8x1xi32>
    %68 = arith.extui %67 : vector<8x1xi1> to vector<8x1xi32>
    %69 = arith.sitofp %68 : vector<8x1xi32> to vector<8x1xf32>
    %70 = arith.mulf %65, %69 : vector<8x1xf32>
    %71 = vector.shape_cast %70 : vector<8x1xf32> to vector<1x8x1xf32>
    %cst_24 = arith.constant dense<0.000000e+00> : vector<1xf32>
    %72 = vector.multi_reduction <add>, %71, %cst_24 [1, 2] : vector<1x8x1xf32> to vector<1xf32>
    %73 = vector.shape_cast %72 : vector<1xf32> to vector<1x1x1xf32>
    %74 = vector.extract %73[0, 0, 0] : f32 from vector<1x1x1xf32>
    %cst_25 = arith.constant 5.000000e-01 : f32
    %75 = arith.mulf %cst_25, %74 : f32
    %76 = arith.addf %38, %75 : f32
    %c0_26 = arith.constant 0 : index
    %c0_27 = arith.constant 0 : index
    %77 = vector.load %arg3[%c0_26, %c0_27] : memref<8x32xf32, #tpu.memory_space<vmem>>, vector<8x32xf32>
    %78 = vector.extract_strided_slice %0 {offsets = [0, 2], sizes = [8, 1], strides = [1, 1]} : vector<8x3xi32> to vector<8x1xi32>
    %cst_28 = arith.constant dense<0xFF800000> : vector<8xf32>
    %79 = vector.multi_reduction <maximumf>, %77, %cst_28 [1] : vector<8x32xf32> to vector<8xf32>
    %80 = vector.shape_cast %79 : vector<8xf32> to vector<8x1xf32>
    %81 = vector.broadcast %80 : vector<8x1xf32> to vector<8x32xf32>
    %82 = arith.subf %77, %81 : vector<8x32xf32>
    %83 = math.exp %82 : vector<8x32xf32>
    %cst_29 = arith.constant dense<0.000000e+00> : vector<8xf32>
    %84 = vector.multi_reduction <add>, %83, %cst_29 [1] : vector<8x32xf32> to vector<8xf32>
    %85 = vector.shape_cast %84 : vector<8xf32> to vector<8x1xf32>
    %86 = math.log %85 : vector<8x1xf32>
    %87 = tpu.iota {dimensions = array<i32: 1>} : vector<8x32xi32>
    %c0_i32_30 = arith.constant 0 : i32
    %88 = vector.broadcast %c0_i32_30 : i32 to vector<8x1xi32>
    %89 = arith.maxsi %78, %88 : vector<8x1xi32>
    %90 = vector.broadcast %89 : vector<8x1xi32> to vector<8x32xi32>
    %91 = arith.cmpi eq, %87, %90 : vector<8x32xi32>
    %cst_31 = arith.constant 0.000000e+00 : f32
    %92 = vector.broadcast %cst_31 : f32 to vector<8x32xf32>
    %93 = arith.select %91, %82, %92 : vector<8x32xi1>, vector<8x32xf32>
    %cst_32 = arith.constant dense<0.000000e+00> : vector<8xf32>
    %94 = vector.multi_reduction <add>, %93, %cst_32 [1] : vector<8x32xf32> to vector<8xf32>
    %95 = vector.shape_cast %94 : vector<8xf32> to vector<8x1xf32>
    %cst_33 = arith.constant dense<0.000000e+00> : vector<8xf32>
    %96 = vector.multi_reduction <add>, %82, %cst_33 [1] : vector<8x32xf32> to vector<8xf32>
    %97 = vector.shape_cast %96 : vector<8xf32> to vector<8x1xf32>
    %cst_34 = arith.constant 0.899999976 : f32
    %98 = vector.broadcast %cst_34 : f32 to vector<8x1xf32>
    %99 = arith.mulf %98, %95 : vector<8x1xf32>
    %100 = arith.subf %86, %99 : vector<8x1xf32>
    %cst_35 = arith.constant 3.125000e-03 : f32
    %101 = vector.broadcast %cst_35 : f32 to vector<8x1xf32>
    %102 = arith.mulf %101, %97 : vector<8x1xf32>
    %103 = arith.subf %100, %102 : vector<8x1xf32>
    %c0_i32_36 = arith.constant 0 : i32
    %104 = vector.broadcast %c0_i32_36 : i32 to vector<8x1xi32>
    %105 = arith.cmpi sge, %78, %104 : vector<8x1xi32>
    %106 = arith.extui %105 : vector<8x1xi1> to vector<8x1xi32>
    %107 = arith.sitofp %106 : vector<8x1xi32> to vector<8x1xf32>
    %108 = arith.mulf %103, %107 : vector<8x1xf32>
    %109 = vector.shape_cast %108 : vector<8x1xf32> to vector<1x8x1xf32>
    %cst_37 = arith.constant dense<0.000000e+00> : vector<1xf32>
    %110 = vector.multi_reduction <add>, %109, %cst_37 [1, 2] : vector<1x8x1xf32> to vector<1xf32>
    %111 = vector.shape_cast %110 : vector<1xf32> to vector<1x1x1xf32>
    %112 = vector.extract %111[0, 0, 0] : f32 from vector<1x1x1xf32>
    %cst_38 = arith.constant 2.500000e-01 : f32
    %113 = arith.mulf %cst_38, %112 : f32
    %114 = arith.addf %76, %113 : f32
    %115 = vector.broadcast %114 : f32 to vector<1x8x128xf32>
    %c0_39 = arith.constant 0 : index
    %c0_40 = arith.constant 0 : index
    %c0_41 = arith.constant 0 : index
    %116 = vector.load %arg5[%c0_39, %c0_40, %c0_41] : memref<1x8x128xf32, #tpu.memory_space<vmem>>, vector<1x8x128xf32>
    tpu.vector_store %arg5[%c0_39, %c0_40, %c0_41], %115 {strides = array<i32>} : memref<1x8x128xf32, #tpu.memory_space<vmem>>, vector<1x8x128xf32>,
    return
  }
  func.func @transform_0(%arg0: i32) -> (i32, i32) {
    %c0_i32 = arith.constant 0 : i32
    %c0_i32_0 = arith.constant 0 : i32
    return %arg0, %c0_i32 : i32, i32
  }
  func.func @transform_1(%arg0: i32) -> (i32, i32) {
    %c0_i32 = arith.constant 0 : i32
    %c0_i32_0 = arith.constant 0 : i32
    return %arg0, %c0_i32 : i32, i32
  }
  func.func @transform_2(%arg0: i32) -> (i32, i32) {
    %c0_i32 = arith.constant 0 : i32
    %c0_i32_0 = arith.constant 0 : i32
    return %arg0, %c0_i32 : i32, i32
  }
  func.func @transform_3(%arg0: i32) -> (i32, i32) {
    %c0_i32 = arith.constant 0 : i32
    %c0_i32_0 = arith.constant 0 : i32
    return %arg0, %c0_i32 : i32, i32
  }
  func.func @transform_4(%arg0: i32) -> (i32, i32, i32) {
    %c0_i32 = arith.constant 0 : i32
    %c0_i32_0 = arith.constant 0 : i32
    %c0_i32_1 = arith.constant 0 : i32
    return %arg0, %c0_i32, %c0_i32_0 : i32, i32, i32
  }
}

</mosaic_0001>

<bundles_post_ra>
// kernel: tpu_custom_call.1
= control target key start
LH: loop header
LB: loop body
LE: loop exit
PB: predicated region body
PF: predicated region fallthrough
CT: control target
= control target key end

     0   :  { %9 = vsyncpa [#allocation3], 0  ;;  %s363_s0 = inlined_call_operand.vmem [shape: f32[8,8], index: 0, kind: input, shape index: {}]   ;;  %s364_s1 = inlined_call_operand.hbm [shape: f32[8,16], index: 1, kind: input, shape index: {}]   ;;  %s365_s2 = inlined_call_operand.hbm [shape: f32[8,32], index: 2, kind: input, shape index: {}]   ;;  %s366_s3 = inlined_call_operand.vmem [shape: s32[8,3], index: 3, kind: input, shape index: {}]   ;;  %s367_s4 = inlined_call_operand.hbm [shape: f32[1,8,128], index: 4, kind: output, shape index: {}]  }
   0x1   :  { %10 = vsyncpa [#allocation6], 0 }
   0x2   :  { %11 = vsyncpa [#allocation4], 0  ;;  %s297_s15 = smov [#allocation2]   ;;  %s298_s17 = smov [#allocation5]  }
   0x3   :  { %s20_s16 = sshll.u32 %s297_s15, 4  ;;  %s30_s18 = sshll.u32 %s298_s17, 4  ;;  %s21_s16 = int_to_ptr.vmem [resolvable:$true] %s20_s16  ;;  %s31_s18 = int_to_ptr.vmem [resolvable:$true] %s30_s18 }
   0x4   :  { %s239_s19 = scalar_lea.vmem %s21_s16, 128  ;;  %p244_p1 = scmp.lt.s32.totalorder %s21_s16, %s21_s16 }
   0x5   :  { %p240_p0 = scmp.ne.s32.totalorder %s21_s16, %s239_s19  ;;  %p245_p2 = scmp.lt.s32.totalorder %s239_s19, %s239_s19 }
   0x7   :  { %p246_p3 = por %p245_p2, %p244_p1 }
   0x9   :  { %p247_p4 = pnand %p246_p3, %p240_p0 }
   0xb   :  { %250 = shalt.err (!%p247_p4)
}
   0xc   :  { %23 = dma.hbm_to_vmem [thread:$0]  %s364_s1, 128, %s21_s16, [#allocation3]  }
   0xd   :  { %s259_s22 = scalar_lea.vmem %s31_s18, 128  ;;  %p264_p6 = scmp.lt.s32.totalorder %s31_s18, %s31_s18 }
   0xe   :  { %p260_p5 = scmp.ne.s32.totalorder %s31_s18, %s259_s22  ;;  %p265_p7 = scmp.lt.s32.totalorder %s259_s22, %s259_s22 }
  0x10   :  { %p266_p8 = por %p265_p7, %p264_p6 }
  0x12   :  { %p267_p9 = pnand %p266_p8, %p260_p5 }
  0x14   :  { %270 = shalt.err (!%p267_p9)
}
  0x15   :  { %33 = dma.hbm_to_vmem [thread:$0]  %s365_s2, 128, %s31_s18, [#allocation6]  }
  0x16   :  { %291 = dma.done.wait [#allocation3], 128  }
  0x17   :  { %292 = vsyncadd [#allocation3], 4294967168 }
  0x18   :  { %293 = dma.done.wait [#allocation6], 128  }
  0x19   :  { %294 = vsyncadd [#allocation6], 4294967168  ;;  %v299_v0 = vmov 1   ;;  %vm92_vm0 = vcmask 130048   ;;  %v91_v1 = vld [vmem:[#allocation2] sm:$0xff]  ;;  %v136_v2 = vld [vmem:[#allocation5] sm:$0xff]  ;;  %v56_v17 = vlaneseq }
  0x1a   :  { %215 = vset.pattern.permute.xlu1 %v299_v0  ;;  %vm137_vm1 = vcmask 261120   ;;  %v340_v3 = vld [vmem:[%s366_s3] sm:$0xff]  ;;  %v93_v4 = vsel %vm92_vm0, %v91_v1, -inf  ;;  %v300_v7 = vmov 2   ;;  %vm44_vm3 = vcmask 64512   ;;  %s304_s3 = smov 126  }
  0x1b   :  { %vm58_vm2 = vcmp.gt.s32.totalorder %v340_v3, 0  ;;  %94 = vmax.xlane.f32.xlu0 %v93_v4  ;;  %v138_v6 = vsel %vm137_vm1, %v136_v2, -inf  ;;  %v43_v8 = vld [vmem:[%s363_s0] sm:$0xff]  ;;  %v301_v10 = vmov 0   ;;  %v57_v18 = vand.u32 127, %v56_v17  ;;  %s303_s0 = smov 127  }
  0x1c   :  { %v59_v5 = vsel %vm58_vm2, %v340_v3, 0  ;;  %v45_v9 = vsel %vm44_vm3, %v43_v8, -inf  ;;  %217 = vset.pattern.permute.xlu0 %v301_v10  ;;  %vm75_vm7 = vcmp.ge.s32.totalorder %v340_v3, 0  ;;  %v302_v56 = vmov 0.0   ;;  %s305_s7 = smov [#allocation7]  }
  0x1d   :  { %105 = vperm.xlu1 %215, %v59_v5   ;;  %v199_v57 = vsel %vm75_vm7, 1.0, %v302_v56  ;;  %vm79_vm8 = vcmask 7168   ;;  %s189_s8 = sshll.u32 %s305_s7, 4  ;;  %s190_s8 = int_to_ptr.vmem [resolvable:$true] %s189_s8 }
  0x1e   :  { %s271_s10 = scalar_lea.vmem %s190_s8, 128  ;;  %p276_p11 = scmp.lt.s32.totalorder %s190_s8, %s190_s8 }
  0x1f   :  { %139 = vmax.xlane.f32.xlu0 %v138_v6  ;;  %p272_p10 = scmp.ne.s32.totalorder %s190_s8, %s271_s10  ;;  %p277_p12 = scmp.lt.s32.totalorder %s271_s10, %s271_s10 }
  0x21   :  { %216 = vset.pattern.permute.xlu1 %v300_v7  ;;  %p278_p13 = por %p277_p12, %p276_p11 }
  0x22   :  { %150 = vperm.xlu1 %216, %v59_v5  }
  0x23   :  { %46 = vmax.xlane.f32.xlu0 %v45_v9  ;;  %p279_p0 = pnand %p278_p13, %p272_p10 }
  0x98   :  { %v106_v19 = vpop.permute.xlu1 %105 }
  0x99   :  { %vm107_vm4 = vcmp.eq.s32.totalorder %v57_v18, %v106_v19 }
  0x9d   :  { %v151_v24 = vpop.permute.xlu1 %150 }
  0x9e   :  { %vm152_vm5 = vcmp.eq.s32.totalorder %v57_v18, %v151_v24 }
  0xa4   :  { %v95_v11 = vpop.xlane.xlu0 %94 }
  0xa5   :  { %v96_v12 = vsub.f32 %v91_v1, %v95_v11 }
  0xa7   :  { %v97_v13 = vmul.f32 1.442695, %v96_v12  ;;  %v108_v22 = vsel %vm107_vm4, %v96_v12, 0.0  ;;  %v112_v27 = vsel %vm92_vm0, %v96_v12, 0.0 }
  0xa8   :  { %v140_v14 = vpop.xlane.xlu0 %139  ;;  %v109_v26 = vsel %vm92_vm0, %v108_v22, 0.0 }
  0xa9   :  { %219 = vpow2.f32 %v97_v13  ;;  %v141_v15 = vsub.f32 %v136_v2, %v140_v14 }
  0xab   :  { %v142_v16 = vmul.f32 1.442695, %v141_v15  ;;  %v153_v28 = vsel %vm152_vm5, %v141_v15, 0.0  ;;  %v157_v30 = vsel %vm137_vm1, %v141_v15, 0.0 }
  0xac   :  { %v154_v29 = vsel %vm137_vm1, %v153_v28, 0.0  ;;  %v47_v31 = vpop.xlane.xlu0 %46 }
  0xad   :  { %221 = vpow2.f32 %v142_v16  ;;  %v48_v32 = vsub.f32 %v43_v8, %v47_v31 }
  0xaf   :  { %v49_v33 = vmul.f32 1.442695, %v48_v32  ;;  %v68_v43 = vsel %vm44_vm3, %v48_v32, 0.0 }
  0xb1   :  { %223 = vpow2.f32 %v49_v33 }
  0xb6   :  { %v220_v20 = vpop.eup %219 }
  0xb7   :  { %v99_v21 = vsel %vm92_vm0, %v220_v20, 0.0 }
  0xb8   :  { %100 = vadd.xlane.f32.xlu1 %v99_v21 }
  0xba   :  { %v222_v23 = vpop.eup %221 }
  0xbb   :  { %v144_v25 = vsel %vm137_vm1, %v222_v23, 0.0 }
  0xbc   :  { %145 = vadd.xlane.f32.xlu0 %v144_v25  ;;  %110 = vadd.xlane.f32.xlu1 %v109_v26 }
  0xbe   :  { %v224_v34 = vpop.eup %223 }
  0xbf   :  { %v51_v35 = vsel %vm44_vm3, %v224_v34, 0.0 }
  0xc0   :  { %113 = vadd.xlane.f32.xlu1 %v112_v27 }
  0xc4   :  { %155 = vadd.xlane.f32.xlu1 %v154_v29 }
  0xc8   :  { %158 = vadd.xlane.f32.xlu1 %v157_v30 }
  0xd2   :  { %61 = vperm.xlu0 %217, %v59_v5  }
  0xd6   :  { %218 = vset.pattern.permute.xlu0 %v300_v7 }
  0xf1   :  { %52 = vadd.xlane.f32.xlu0 %v51_v35 }
 0x141   :  { %v101_v36 = vpop.xlane.xlu1 %100 }
 0x142   :  { %225 = vlog2.f32 %v101_v36 }
 0x145   :  { %v146_v37 = vpop.xlane.xlu0 %145  ;;  %v111_v38 = vpop.xlane.xlu1 %110 }
 0x146   :  { %227 = vlog2.f32 %v146_v37  ;;  %v115_v48 = vmul.f32 0.9, %v111_v38 }
 0x149   :  { %v114_v42 = vpop.xlane.xlu1 %113 }
 0x14a   :  { %v117_v51 = vmul.f32 0.00625, %v114_v42 }
 0x14d   :  { %v62_v39 = vpop.permute.xlu0 %61  ;;  %v156_v47 = vpop.xlane.xlu1 %155 }
 0x14e   :  { %vm63_vm6 = vcmp.eq.s32.totalorder %v57_v18, %v62_v39  ;;  %v160_v52 = vmul.f32 0.9, %v156_v47 }
 0x14f   :  { %v64_v40 = vsel %vm63_vm6, %v48_v32, 0.0  ;;  %v226_v44 = vpop.eup %225 }
 0x150   :  { %v65_v41 = vsel %vm44_vm3, %v64_v40, 0.0  ;;  %v103_v45 = vmul.f32 0.6931472, %v226_v44 }
 0x151   :  { %66 = vadd.xlane.f32.xlu1 %v65_v41  ;;  %v159_v53 = vpop.xlane.xlu1 %158 }
 0x152   :  { %v116_v50 = vsub.f32 %v103_v45, %v115_v48  ;;  %v162_v58 = vmul.f32 0.003125, %v159_v53 }
 0x153   :  { %v228_v46 = vpop.eup %227 }
 0x154   :  { %v148_v49 = vmul.f32 0.6931472, %v228_v46  ;;  %v118_v54 = vsub.f32 %v116_v50, %v117_v51 }
 0x155   :  { %69 = vadd.xlane.f32.xlu1 %v68_v43 }
 0x156   :  { %v161_v55 = vsub.f32 %v148_v49, %v160_v52  ;;  %v119_v60 = vmul.f32 %v199_v57, %v118_v54 }
 0x158   :  { %v163_v59 = vsub.f32 %v161_v55, %v162_v58 }
 0x15a   :  { %v164_v61 = vmul.f32 %v199_v57, %v163_v59 }
 0x166   :  { %121 = vrot.lane.b32.xlu1 %v119_v60, %s303_s0 }
 0x16a   :  { %166 = vrot.lane.b32.xlu1 %v164_v61, %s304_s3 }
 0x17a   :  { %v53_v62 = vpop.xlane.xlu0 %52 }
 0x17b   :  { %229 = vlog2.f32 %v53_v62 }
 0x188   :  { %v230_v63 = vpop.eup %229 }
 0x189   :  { %v55_v1 = vmul.f32 0.6931472, %v230_v63 }
 0x1da   :  { %v67_v0 = vpop.xlane.xlu1 %66 }
 0x1db   :  { %v71_v2 = vmul.f32 0.9, %v67_v0 }
 0x1dd   :  { %v72_v4 = vsub.f32 %v55_v1, %v71_v2 }
 0x1de   :  { %v70_v3 = vpop.xlane.xlu1 %69 }
 0x1df   :  { %v73_v5 = vmul.f32 0.0125, %v70_v3 }
 0x1e1   :  { %v74_v6 = vsub.f32 %v72_v4, %v73_v5 }
 0x1e2   :  { %v122_v7 = vpop.permute.xlu1 %121 }
 0x1e3   :  { %v124_v8 = vsel %vm79_vm8, %v122_v7, 0.0  ;;  %v78_v9 = vmul.f32 %v199_v57, %v74_v6 }
 0x1e4   :  { %125 = vadd.xlane.f32.xlu0 %v124_v8 }
 0x1e5   :  { %v80_v10 = vsel %vm79_vm8, %v78_v9, 0.0 }
 0x1e6   :  { %81 = vadd.xlane.f32.xlu1 %v80_v10  ;;  %v167_v11 = vpop.permute.xlu1 %166 }
 0x1e7   :  { %v169_v12 = vsel %vm79_vm8, %v167_v11, 0.0 }
 0x1e8   :  { %170 = vadd.xlane.f32.xlu0 %v169_v12 }
 0x26d   :  { %v126_v13 = vpop.xlane.xlu0 %125 }
 0x26e   :  { %v127_v14 = vrot.slane %v126_v13, 4 }
 0x26f   :  { %v82_v15 = vpop.xlane.xlu1 %81 }
 0x270   :  { %v128_v16 = vadd.f32 %v127_v14, %v126_v13  ;;  %v83_v17 = vrot.slane %v82_v15, 4 }
 0x271   :  { %v171_v18 = vpop.xlane.xlu0 %170 }
 0x272   :  { %v129_v19 = vrot.slane %v128_v16, 2  ;;  %v84_v20 = vadd.f32 %v83_v17, %v82_v15  ;;  %v172_v21 = vrot.slane %v171_v18, 4 }
 0x274   :  { %v85_v22 = vrot.slane %v84_v20, 2  ;;  %v173_v23 = vadd.f32 %v172_v21, %v171_v18  ;;  %v130_v24 = vadd.f32 %v129_v19, %v128_v16 }
 0x276   :  { %v174_v25 = vrot.slane %v173_v23, 2  ;;  %v86_v26 = vadd.f32 %v85_v22, %v84_v20  ;;  %v131_v27 = vrot.slane %v130_v24, 1 }
 0x278   :  { %v175_v28 = vadd.f32 %v174_v25, %v173_v23  ;;  %v87_v29 = vrot.slane %v86_v26, 1  ;;  %v132_v32 = vadd.f32 %v131_v27, %v130_v24 }
 0x27a   :  { %v88_v30 = vadd.f32 %v87_v29, %v86_v26  ;;  %v176_v31 = vrot.slane %v175_v28, 1 }
 0x27c   :  { %200 = vpush %v88_v30  ;;  %v177_v33 = vadd.f32 %v176_v31, %v175_v28 }
 0x27d   :  { %202 = vpush %v132_v32 }
 0x27e   :  { %204 = vpush %v177_v33 }
 0x2ad   :  { %s201_s27 = spop %200 }
 0x2ae   :  { %s203_s28 = spop %202 }
 0x2af   :  { %s134_s29 = smul.f32 0.5, %s203_s28  ;;  %s205_s30 = spop %204 }
 0x2b0   :  { %s179_s5 = smul.f32 0.25, %s205_s30 }
 0x2b1   :  { %s135_s6 = sadd.f32 %s201_s27, %s134_s29 }
 0x2b3   :  { %s180_s9 = sadd.f32 %s179_s5, %s135_s6 }
 0x2b5   :  { %v181_v34 = vstv %s180_s9 }
 0x2b6   :  { %182 = vst [vmem:[#allocation7] sm:$0xff] %v181_v34 }
 0x2b7   :  { %282 = shalt.err (!%p279_p0)
}
 0x2b8   :  { %192 = dma.vmem_to_hbm [thread:$0]  %s190_s8, 128, %s367_s4, [#allocation4]  }
 0x2b9   :  { %295 = dma.done.wait [#allocation4], 128  }
 0x2ba   :  { %296 = vsyncadd [#allocation4], 4294967168 }
 0x2bb   :  { %196 = vsyncpa [#allocation3], 1 }
 0x2bc   :  { %197 = vsyncpa [#allocation6], 1 }
 0x2bd   :  { %198 = vsyncpa [#allocation4], 1 }

</bundles_post_ra>
